<compile_context>
chip_gen: v5e
topology: v5e:2x2
jax: 0.10.0
libtpu: 0.0.40
codegen_flags: <defaults>
</compile_context>

<pallas_src>
import functools

import jax
import jax.numpy as jnp
from jax.experimental import pallas as pl
from jax.experimental.pallas import tpu as pltpu

# 16-row alignment: safe sublane granularity for both f32 (8) and bf16 (16)
# blocks, so the same tiling works for the f32 input and the bf16 output.
_ROW_ALIGN = 16


def _round_up(x, m):
    return (x + m - 1) // m * m


def _tensorcores_per_chip():
    """Best-effort detection of per-chip TensorCore count (v7x has 2)."""
    try:
        kind = jax.devices()[0].device_kind.lower()
    except Exception:
        return 1
    return 2 if "v7" in kind else 1


def _make_fused_mlp_kernel(num_layers):
    """Kernel body: in-kernel f32->bf16 cast, then chained bf16 MXU matmuls
    with f32 bias+ReLU epilogues; final cast to the output dtype."""

    def kernel(*refs):
        x_ref = refs[0]
        o_ref = refs[-1]
        h = x_ref[...].astype(jnp.bfloat16)          # (tile, in_dim), VPU cast
        y = None
        for l in range(num_layers):
            w_ref = refs[1 + 2 * l]                  # (in_dim, out_dim) bf16
            b_ref = refs[2 + 2 * l]                  # (1, out_dim)      f32
            y = jnp.dot(h, w_ref[...], preferred_element_type=jnp.float32)
            y = jnp.maximum(y + b_ref[...], 0.0)     # f32 epilogue
            if l + 1 < num_layers:
                h = y.astype(jnp.bfloat16)           # back to bf16 for next MXU pass
        o_ref[...] = y.astype(o_ref.dtype)           # bf16 writeback by default

    return kernel


@functools.partial(jax.jit, static_argnames=("tile", "out_dtype"))
def _mlp_forward_impl(x, params, *, tile, out_dtype):
    bs, num_frames, feat = x.shape
    n = bs * num_frames
    h = x.reshape(n, feat)                           # contiguous reshape: free

    # Pad rows only to the sublane alignment (at most _ROW_ALIGN-1 dead rows),
    # and only when needed.  Padded rows compute relu(bias) garbage; they are
    # sliced off below and never otherwise read.
    n_pad = _round_up(n, _ROW_ALIGN)
    if n_pad != n:
        h = jnp.pad(h, ((0, n_pad - n), (0, 0)))

    num_layers = len(params)
    out_dim = params[-1][0].shape[1]
    grid = (pl.cdiv(n_pad, tile),)

    flat_params = []
    in_specs = [pl.BlockSpec((tile, feat), lambda i: (i, 0))]
    for (w, b) in params:
        flat_params += [w, b]
        # Constant index_map -> weights/bias are DMA'd once and stay
        # VMEM-resident across all row tiles.
        in_specs.append(pl.BlockSpec(w.shape, lambda i: (0, 0)))
        in_specs.append(pl.BlockSpec(b.shape, lambda i: (0, 0)))

    out = pl.pallas_call(
        _make_fused_mlp_kernel(num_layers),
        out_shape=jax.ShapeDtypeStruct((n_pad, out_dim), out_dtype),
        grid=grid,
        in_specs=in_specs,
        out_specs=pl.BlockSpec((tile, out_dim), lambda i: (i, 0)),
        compiler_params=pltpu.CompilerParams(
            dimension_semantics=("parallel",),       # row tiles are independent
            vmem_limit_bytes=32 * 1024 * 1024,       # v5e default is only 16 MiB
        ),
    )(h, *flat_params)

    if n_pad != n:
        out = out[:n]
    return out.reshape(bs, num_frames, out_dim)


def mlp_forward(x, params, *, tile_rows=4096, out_dtype=jnp.bfloat16):
    """x: (bs, num_frames, feature_dim) f32; params: tuple of (w_bf16, bias_f32)."""
    bs, num_frames, _ = x.shape
    n_pad = _round_up(bs * num_frames, _ROW_ALIGN)

    # Biggest row tile that fits comfortably in VMEM amortizes the fixed
    # per-grid-step overhead (this kernel is writeback/overhead bound).
    tile = min(tile_rows, n_pad)
    # v7x: make sure the parallel grid has >= 2 steps so both TensorCores work.
    if _tensorcores_per_chip() >= 2 and n_pad >= 2 * _ROW_ALIGN:
        tile = min(tile, _round_up(pl.cdiv(n_pad, 2), _ROW_ALIGN))
    tile = _round_up(tile, _ROW_ALIGN)

    return _mlp_forward_impl(x, params, tile=tile, out_dtype=out_dtype)


def init_mlp_params(key, hidden_units, eps=1e-5):
    """Deterministic params matching MLP(hidden_units), with BN folded in."""
    assert len(hidden_units) >= 2
    assert hidden_units[-1] == 256
    params = []
    in_dim = hidden_units[0]
    for out_dim in hidden_units[1:]:
        key, kw, kb, kg, kbeta = jax.random.split(key, 5)
        bound = 1.0 / (in_dim ** 0.5)
        # Linear (stored pre-transposed as (in, out) so the kernel computes x @ W).
        w = jax.random.uniform(kw, (in_dim, out_dim), jnp.float32, -bound, bound)
        b = jax.random.uniform(kb, (1, out_dim), jnp.float32, -bound, bound)
        # BatchNorm1d params / running stats (perturbed gamma/beta so the fold
        # is actually exercised; fresh running stats: mean=0, var=1).
        gamma = 1.0 + 0.1 * jax.random.normal(kg, (1, out_dim), jnp.float32)
        beta = 0.1 * jax.random.normal(kbeta, (1, out_dim), jnp.float32)
        running_mean = jnp.zeros((1, out_dim), jnp.float32)
        running_var = jnp.ones((1, out_dim), jnp.float32)
        # Fold BN (inference) into the linear layer.
        scale = gamma / jnp.sqrt(running_var + eps)
        w_folded = (w * scale).astype(jnp.bfloat16)            # (in, out) bf16
        bias_folded = (b - running_mean) * scale + beta        # (1, out)  f32
        params.append((w_folded, bias_folded))
        in_dim = out_dim
    return tuple(params)


def mlp_reference(x, params, out_dtype=jnp.bfloat16):
    """Pure-JAX reference mirroring the kernel's exact numerics:
    bf16 input/weights, MXU matmul with f32 accumulation, f32 bias+ReLU."""
    bs, num_frames, feat = x.shape
    h = x.reshape(bs * num_frames, feat).astype(jnp.bfloat16)
    y = None
    for (w, b) in params:
        y = jnp.dot(h, w, preferred_element_type=jnp.float32) + b
        y = jnp.maximum(y, 0.0)
        h = y.astype(jnp.bfloat16)
    return y.astype(out_dtype).reshape(bs, num_frames, -1)


if __name__ == "__main__":
    key = jax.random.PRNGKey(0)
    k_in, k_params = jax.random.split(key)

    # TODO(synk): Dropout has no effect at inference; implemented as identity.
    hidden_units = [64, 128, 256]              # last layer must be 256
    bs, num_frames, feature_dim = 2, 8, hidden_units[0]

    x = jax.random.normal(k_in, (bs, num_frames, feature_dim), jnp.float32)
    params = init_mlp_params(k_params, hidden_units)

    out = jax.block_until_ready(mlp_forward(x, params))
    ref = mlp_reference(x, params)

    assert out.shape == (bs, num_frames, 256), out.shape
    assert out.dtype == jnp.bfloat16, out.dtype

    o32 = out.astype(jnp.float32)
    r32 = ref.astype(jnp.float32)
    assert bool(jnp.all(jnp.isfinite(o32)))
    assert bool(jnp.all(o32 >= 0.0))           # ReLU output
    assert bool(jnp.allclose(o32, r32, atol=2e-2, rtol=2e-2))
    print("KERNEL_OK")
</pallas_src>

<mosaic_0001>
module attributes {stable_mosaic.version = 11 : i64} {
  func.func @kernel(%arg0: i32, %arg1: memref<16x64xf32, #tpu.memory_space<vmem>>, %arg2: memref<64x128xbf16, #tpu.memory_space<vmem>>, %arg3: memref<1x128xf32, #tpu.memory_space<vmem>>, %arg4: memref<128x256xbf16, #tpu.memory_space<vmem>>, %arg5: memref<1x256xf32, #tpu.memory_space<vmem>>, %arg6: memref<16x256xbf16, #tpu.memory_space<vmem>>) attributes {dimension_semantics = [#tpu.dimension_semantics<parallel>], iteration_bounds = array<i64: 1>, scalar_prefetch = 0 : i64, scratch_operands = 0 : i64, tpu.core_type = #tpu.core_type<tc>, window_params = [{transform_indices = @transform_0, window_bounds = array<i64: 16, 64>}, {pipeline_mode = #tpu.pipeline_mode<synchronous>, transform_indices = @transform_1, window_bounds = array<i64: 64, 128>}, {pipeline_mode = #tpu.pipeline_mode<synchronous>, transform_indices = @transform_2, window_bounds = array<i64: 1, 128>}, {pipeline_mode = #tpu.pipeline_mode<synchronous>, transform_indices = @transform_3, window_bounds = array<i64: 128, 256>}, {pipeline_mode = #tpu.pipeline_mode<synchronous>, transform_indices = @transform_4, window_bounds = array<i64: 1, 256>}, {transform_indices = @transform_5, window_bounds = array<i64: 16, 256>}]} {
    %c0 = arith.constant 0 : index
    %c0_0 = arith.constant 0 : index
    %0 = vector.load %arg1[%c0, %c0_0] : memref<16x64xf32, #tpu.memory_space<vmem>>, vector<16x64xf32>
    %1 = arith.truncf %0 : vector<16x64xf32> to vector<16x64xbf16>
    %c0_1 = arith.constant 0 : index
    %c0_2 = arith.constant 0 : index
    %2 = vector.load %arg2[%c0_1, %c0_2] : memref<64x128xbf16, #tpu.memory_space<vmem>>, vector<64x128xbf16>
    %cst = arith.constant dense<0.000000e+00> : vector<16x128xf32>
    %3 = tpu.matmul %1, %2, %cst {dimension_numbers = #tpu.dot_dimension_numbers<[1], [0], [0], [1], [0, 0, 1, 1], [], []>} : vector<16x64xbf16>, vector<64x128xbf16>, vector<16x128xf32> -> vector<16x128xf32>
    %c0_3 = arith.constant 0 : index
    %c0_4 = arith.constant 0 : index
    %4 = vector.load %arg3[%c0_3, %c0_4] : memref<1x128xf32, #tpu.memory_space<vmem>>, vector<1x128xf32>
    %5 = vector.broadcast %4 : vector<1x128xf32> to vector<16x128xf32>
    %6 = arith.addf %3, %5 : vector<16x128xf32>
    %cst_5 = arith.constant 0.000000e+00 : f32
    %7 = vector.broadcast %cst_5 : f32 to vector<16x128xf32>
    %8 = arith.maximumf %6, %7 : vector<16x128xf32>
    %9 = arith.truncf %8 : vector<16x128xf32> to vector<16x128xbf16>
    %c0_6 = arith.constant 0 : index
    %c0_7 = arith.constant 0 : index
    %10 = vector.load %arg4[%c0_6, %c0_7] : memref<128x256xbf16, #tpu.memory_space<vmem>>, vector<128x256xbf16>
    %cst_8 = arith.constant dense<0.000000e+00> : vector<16x256xf32>
    %11 = tpu.matmul %9, %10, %cst_8 {dimension_numbers = #tpu.dot_dimension_numbers<[1], [0], [0], [1], [0, 0, 1, 1], [], []>} : vector<16x128xbf16>, vector<128x256xbf16>, vector<16x256xf32> -> vector<16x256xf32>
    %c0_9 = arith.constant 0 : index
    %c0_10 = arith.constant 0 : index
    %12 = vector.load %arg5[%c0_9, %c0_10] : memref<1x256xf32, #tpu.memory_space<vmem>>, vector<1x256xf32>
    %13 = vector.broadcast %12 : vector<1x256xf32> to vector<16x256xf32>
    %14 = arith.addf %11, %13 : vector<16x256xf32>
    %cst_11 = arith.constant 0.000000e+00 : f32
    %15 = vector.broadcast %cst_11 : f32 to vector<16x256xf32>
    %16 = arith.maximumf %14, %15 : vector<16x256xf32>
    %17 = arith.truncf %16 : vector<16x256xf32> to vector<16x256xbf16>
    %c0_12 = arith.constant 0 : index
    %c0_13 = arith.constant 0 : index
    %18 = vector.load %arg6[%c0_12, %c0_13] : memref<16x256xbf16, #tpu.memory_space<vmem>>, vector<16x256xbf16>
    tpu.vector_store %arg6[%c0_12, %c0_13], %17 {strides = array<i32>} : memref<16x256xbf16, #tpu.memory_space<vmem>>, vector<16x256xbf16>,
    return
  }
  func.func @transform_0(%arg0: i32) -> (i32, i32) {
    %c0_i32 = arith.constant 0 : i32
    %c0_i32_0 = arith.constant 0 : i32
    return %arg0, %c0_i32 : i32, i32
  }
  func.func @transform_1(%arg0: i32) -> (i32, i32) {
    %c0_i32 = arith.constant 0 : i32
    %c0_i32_0 = arith.constant 0 : i32
    %c0_i32_1 = arith.constant 0 : i32
    return %c0_i32, %c0_i32_0 : i32, i32
  }
  func.func @transform_2(%arg0: i32) -> (i32, i32) {
    %c0_i32 = arith.constant 0 : i32
    %c0_i32_0 = arith.constant 0 : i32
    %c0_i32_1 = arith.constant 0 : i32
    return %c0_i32, %c0_i32_0 : i32, i32
  }
  func.func @transform_3(%arg0: i32) -> (i32, i32) {
    %c0_i32 = arith.constant 0 : i32
    %c0_i32_0 = arith.constant 0 : i32
    %c0_i32_1 = arith.constant 0 : i32
    return %c0_i32, %c0_i32_0 : i32, i32
  }
  func.func @transform_4(%arg0: i32) -> (i32, i32) {
    %c0_i32 = arith.constant 0 : i32
    %c0_i32_0 = arith.constant 0 : i32
    %c0_i32_1 = arith.constant 0 : i32
    return %c0_i32, %c0_i32_0 : i32, i32
  }
  func.func @transform_5(%arg0: i32) -> (i32, i32) {
    %c0_i32 = arith.constant 0 : i32
    %c0_i32_0 = arith.constant 0 : i32
    return %arg0, %c0_i32 : i32, i32
  }
}

</mosaic_0001>

<bundles_post_ra>
// kernel: _mlp_forward_impl.1
= control target key start
LH: loop header
LB: loop body
LE: loop exit
PB: predicated region body
PF: predicated region fallthrough
CT: control target
= control target key end

     0   :  { %10 = vsyncpa [#allocation3], 0  ;;  %s564_s0 = inlined_call_operand.hbm [shape: f32[16,64], index: 0, kind: input, shape index: {}]   ;;  %s565_s1 = inlined_call_operand.hbm [shape: bf16[64,128], index: 1, kind: input, shape index: {}]   ;;  %s566_s2 = inlined_call_operand.vmem [shape: f32[1,128], index: 2, kind: input, shape index: {}]   ;;  %s567_s3 = inlined_call_operand.hbm [shape: bf16[128,256], index: 3, kind: input, shape index: {}]   ;;  %s568_s4 = inlined_call_operand.vmem [shape: f32[1,256], index: 4, kind: input, shape index: {}]   ;;  %s569_s5 = inlined_call_operand.hbm [shape: bf16[16,256], index: 5, kind: output, shape index: {}]  }
   0x1   :  { %11 = vsyncpa [#allocation6], 0  ;;  %s30_s20 = sshll.u32 %s565_s1, 4  ;;  %s31_s20 = int_to_ptr.hbm [resolvable:$true] %s30_s20 }
   0x2   :  { %12 = vsyncpa [#allocation4], 0  ;;  %s499_s21 = smov [#allocation5]   ;;  %s17_s25 = sshll.u32 %s564_s0, 4  ;;  %s18_s25 = int_to_ptr.hbm [resolvable:$true] %s17_s25 }
   0x3   :  { %s32_s22 = sshll.u32 %s499_s21, 4  ;;  %s500_s26 = smov 64   ;;  %s33_s22 = int_to_ptr.vmem [resolvable:$true] %s32_s22 }
   0x4   :  { %s501_s27 = smov 4   ;;  %s502_s28 = smov [#allocation2]  }
   0x5   :  { %38 = dma.hbm_to_vmem [thread:$0]  %s31_s20, 512, %s33_s22, [#allocation6], %s500_s26, %s500_s26, %s501_s27  }
   0x6   :  { %s19_s29 = sshll.u32 %s502_s28, 4  ;;  %s503_s30 = smov 128   ;;  %s20_s29 = int_to_ptr.vmem [resolvable:$true] %s19_s29 }
   0x7   :  { %s504_s6 = smov 8   ;;  %s45_s8 = sshll.u32 %s567_s3, 4  ;;  %s46_s8 = int_to_ptr.hbm [resolvable:$true] %s45_s8 }
   0x8   :  { %25 = dma.hbm_to_vmem [thread:$0]  %s18_s25, 256, %s20_s29, [#allocation3], %s503_s30, %s503_s30, %s504_s6  }
   0x9   :  { %s505_s9 = smov [#allocation7]  }
   0xa   :  { %s47_s0 = sshll.u32 %s505_s9, 4  ;;  %s48_s0 = int_to_ptr.vmem [resolvable:$true] %s47_s0 }
   0xb   :  { %53 = dma.hbm_to_vmem [thread:$0]  %s46_s8, 2048, %s48_s0, [#allocation6], %s503_s30, %s503_s30, %s504_s6  }
   0xc   :  { %493 = dma.done.wait [#allocation3], 256  }
   0xd   :  { %494 = vsyncadd [#allocation3], 4294967040 }
   0xe   :  { %495 = dma.done.wait [#allocation6], 2560  }
   0xf   :  { %496 = vsyncadd [#allocation6], 4294964736  ;;  %v371_v0 = vld [vmem:[#allocation5 + $0x18] sm:$0xff]  ;;  %v370_v1 = vld [vmem:[#allocation5 + $0x10] sm:$0xff]  ;;  %vm108_vm0 = vcmask 523264  }
  0x10   :  { %116 = vmatpush.bf16.msra.mxu0 %v371_v0  ;;  %v362_v2 = vld [vmem:[#allocation7 + $0x70] sm:$0xf]  ;;  %v387_v3 = vld [vmem:[#allocation7 + $0x74] sm:$0xf0]  ;;  %v386_v4 = vld [vmem:[#allocation7 + $0x74] sm:$0xf] }
  0x11   :  { %v363_v5 = vor.u32 %v387_v3, %v362_v2  ;;  %v364_v6 = vld [vmem:[#allocation7 + $0x78] sm:$0xf0]  ;;  %v354_v7 = vld [vmem:[#allocation7 + $0x60] sm:$0xf]  ;;  %v385_v8 = vld [vmem:[#allocation7 + $0x64] sm:$0xf0] }
  0x12   :  { %v367_v9 = vor.u32 %v386_v4, %v364_v6  ;;  %v384_v10 = vld [vmem:[#allocation7 + $0x64] sm:$0xf]  ;;  %v356_v11 = vld [vmem:[#allocation7 + $0x68] sm:$0xf0]  ;;  %v355_v12 = vor.u32 %v385_v8, %v354_v7  ;;  %v346_v15 = vld [vmem:[#allocation7 + $0x50] sm:$0xf] }
  0x13   :  { %231 = vmatpush.bf16.msra.mxu1 %v363_v5  ;;  %v369_v13 = vld [vmem:[#allocation5 + $0x8] sm:$0xff]  ;;  %v359_v14 = vor.u32 %v384_v10, %v356_v11  ;;  %v383_v16 = vld [vmem:[#allocation7 + $0x54] sm:$0xf0]  ;;  %v382_v17 = vld [vmem:[#allocation7 + $0x54] sm:$0xf] }
  0x14   :  { %117 = vmatpush.bf16.msra.mxu0 %v370_v1  ;;  %245 = vmatpush.bf16.msra.mxu2 %v367_v9  ;;  %v348_v18 = vld [vmem:[#allocation7 + $0x58] sm:$0xf0]  ;;  %v368_v19 = vld [vmem:[#allocation5] sm:$0xff]  ;;  %v69_v20 = vld [vmem:[#allocation2] sm:$0xff]  ;;  %v347_v21 = vor.u32 %v383_v16, %v346_v15 }
  0x15   :  { %v70_v22 = vld [vmem:[#allocation2 + $0x8] sm:$0xff]  ;;  %v351_v23 = vor.u32 %v382_v17, %v348_v18  ;;  %v338_v24 = vld [vmem:[#allocation7 + $0x40] sm:$0xf]  ;;  %v381_v25 = vld [vmem:[#allocation7 + $0x44] sm:$0xf0] }
  0x16   :  { %v380_v26 = vld [vmem:[#allocation7 + $0x44] sm:$0xf]  ;;  %v340_v27 = vld [vmem:[#allocation7 + $0x48] sm:$0xf0]  ;;  %v71_v28 = vpack.c.bf16 %v70_v22, %v69_v20  ;;  %v339_v29 = vor.u32 %v381_v25, %v338_v24  ;;  %v330_v31 = vld [vmem:[#allocation7 + $0x30] sm:$0xf] }
  0x17   :  { %232 = vmatpush.bf16.msra.mxu1 %v355_v12  ;;  %v343_v30 = vor.u32 %v380_v26, %v340_v27  ;;  %v379_v32 = vld [vmem:[#allocation7 + $0x34] sm:$0xf0]  ;;  %v378_v33 = vld [vmem:[#allocation7 + $0x34] sm:$0xf]  ;;  %v332_v35 = vld [vmem:[#allocation7 + $0x38] sm:$0xf0] }
  0x18   :  { %118 = vmatpush.bf16.msra.mxu0 %v369_v13  ;;  %246 = vmatpush.bf16.msra.mxu2 %v359_v14  ;;  %v331_v34 = vor.u32 %v379_v32, %v330_v31  ;;  %v335_v36 = vor.u32 %v378_v33, %v332_v35  ;;  %v322_v37 = vld [vmem:[#allocation7 + $0x20] sm:$0xf]  ;;  %v377_v38 = vld [vmem:[#allocation7 + $0x24] sm:$0xf0]  ;;  %v376_v39 = vld [vmem:[#allocation7 + $0x24] sm:$0xf] }
  0x19   :  { %v323_v40 = vor.u32 %v377_v38, %v322_v37  ;;  %v324_v41 = vld [vmem:[#allocation7 + $0x28] sm:$0xf0]  ;;  %v314_v43 = vld [vmem:[#allocation7 + $0x10] sm:$0xf]  ;;  %v375_v44 = vld [vmem:[#allocation7 + $0x14] sm:$0xf0] }
  0x1a   :  { %v327_v42 = vor.u32 %v376_v39, %v324_v41  ;;  %v374_v45 = vld [vmem:[#allocation7 + $0x14] sm:$0xf]  ;;  %v315_v46 = vor.u32 %v375_v44, %v314_v43  ;;  %v316_v47 = vld [vmem:[#allocation7 + $0x18] sm:$0xf0]  ;;  %v306_v49 = vld [vmem:[#allocation7] sm:$0xf] }
  0x1b   :  { %233 = vmatpush.bf16.msra.mxu1 %v347_v21  ;;  %v319_v48 = vor.u32 %v374_v45, %v316_v47  ;;  %v373_v50 = vld [vmem:[#allocation7 + $0x4] sm:$0xf0]  ;;  %v372_v51 = vld [vmem:[#allocation7 + $0x4] sm:$0xf]  ;;  %v308_v53 = vld [vmem:[#allocation7 + $0x8] sm:$0xf0] }
  0x1c   :  { %119 = vmatpush.bf16.msra.mxu0 %v368_v19  ;;  %247 = vmatpush.bf16.msra.mxu2 %v351_v23  ;;  %v307_v52 = vor.u32 %v373_v50, %v306_v49  ;;  %v311_v54 = vor.u32 %v372_v51, %v308_v53  ;;  %v396_v56 = vld [vmem:[%s566_s2] ss:$0 sm:$0xff]  ;;  %s506_s2 = smov [#allocation8]  }
  0x1d   :  { %v145_v63 = vld [vmem:[%s568_s4] sm:$0x3]  ;;  %s271_s13 = sshll.u32 %s506_s2, 4  ;;  %s273_s4 = sshll.u32 %s569_s5, 4  ;;  %s272_s13 = int_to_ptr.vmem [resolvable:$true] %s271_s13  ;;  %s274_s4 = int_to_ptr.hbm [resolvable:$true] %s273_s4 }
  0x1e   :  { %v147_v1 = vperm.slane %v145_v63, 0  ;;  %v148_v2 = vperm.slane %v145_v63, 1 }
  0x1f   :  { %303 = vmatmul.msk.bf16.vlgmr.msra.gmra.mxu0 %vm108_vm0, %v71_v28  ;;  %234 = vmatpush.bf16.msra.mxu1 %v339_v29 }
  0x20   :  { %248 = vmatpush.bf16.msra.mxu2 %v343_v30 }
  0x23   :  { %235 = vmatpush.bf16.msra.mxu1 %v331_v34 }
  0x24   :  { %249 = vmatpush.bf16.msra.mxu2 %v335_v36 }
  0x27   :  { %236 = vmatpush.bf16.msra.mxu1 %v323_v40 }
  0x28   :  { %250 = vmatpush.bf16.msra.mxu2 %v327_v42 }
  0x2b   :  { %237 = vmatpush.bf16.msra.mxu1 %v315_v46 }
  0x2c   :  { %251 = vmatpush.bf16.msra.mxu2 %v319_v48 }
  0x2f   :  { %238 = vmatpush.bf16.msra.mxu1 %v307_v52 }
  0x30   :  { %252 = vmatpush.bf16.msra.mxu2 %v311_v54 }
  0x9c   :  { %v121_v55 = vpop.f32.mrf.mxu0 }
  0x9d   :  { %v122_v57 = vadd.f32 %v396_v56, %v121_v55 }
  0x9f   :  { %v126_v60 = vmax.f32 %v122_v57, 0.0 }
  0xa4   :  { %v123_v58 = vpop.f32.mrf.mxu0 }
  0xa5   :  { %v124_v59 = vadd.f32 %v396_v56, %v123_v58 }
  0xa7   :  { %v127_v61 = vmax.f32 %v124_v59, 0.0 }
  0xa9   :  { %v128_v62 = vpack.c.bf16 %v127_v61, %v126_v60 }
  0xab   :  { %239 = vmatmul.bf16.vlgmr.msra.gmra.mxu1 %v128_v62  ;;  %253 = vmatmul.bf16.vlgmr.msra.gmra.mxu2 %v128_v62 }
 0x128   :  { %v240_v0 = vpop.f32.mrf.mxu1 }
 0x129   :  { %v241_v3 = vadd.f32 %v240_v0, %v147_v1 }
 0x12b   :  { %v259_v6 = vmax.f32 %v241_v3, 0.0 }
 0x12e   :  { %v254_v4 = vpop.f32.mrf.mxu2 }
 0x12f   :  { %v255_v5 = vadd.f32 %v254_v4, %v148_v2 }
 0x130   :  { %v242_v8 = vpop.f32.mrf.mxu1 }
 0x131   :  { %v260_v7 = vmax.f32 %v255_v5, 0.0  ;;  %v243_v10 = vadd.f32 %v242_v8, %v147_v1 }
 0x133   :  { %v263_v9 = vpack.c.bf16 %v260_v7, %v259_v6  ;;  %v261_v13 = vmax.f32 %v243_v10, 0.0 }
 0x135   :  { %265 = vst [vmem:[#allocation8] sm:$0xff] %v263_v9 }
 0x136   :  { %v256_v11 = vpop.f32.mrf.mxu2 }
 0x137   :  { %v257_v12 = vadd.f32 %v256_v11, %v148_v2 }
 0x139   :  { %v262_v14 = vmax.f32 %v257_v12, 0.0 }
 0x13b   :  { %v264_v15 = vpack.c.bf16 %v262_v14, %v261_v13 }
 0x13d   :  { %266 = vst [vmem:[#allocation8 + $0x8] sm:$0xff] %v264_v15 }
 0x13e   :  { %279 = dma.vmem_to_hbm [thread:$0]  %s272_s13, 256, %s274_s4, [#allocation4], %s503_s30, %s503_s30, %s504_s6  }
 0x13f   :  { %497 = dma.done.wait [#allocation4], 256  }
 0x140   :  { %498 = vsyncadd [#allocation4], 4294967040 }
 0x141   :  { %284 = vsyncpa [#allocation3], 1 }
 0x142   :  { %285 = vsyncpa [#allocation6], 1 }
 0x143   :  { %286 = vsyncpa [#allocation4], 1 }

</bundles_post_ra>
